<compile_context>
chip_gen: v7x
topology: tpu7x:2x2x1
jax: 0.10.0
libtpu: 0.0.40
codegen_flags: <defaults>
</compile_context>

<pallas_src>
import jax
import jax.numpy as jnp
from jax.experimental import pallas as pl
from jax.experimental.pallas import tpu as pltpu

_NEG_LARGE = -1e30
_LANE = 128
_SUBLANE = 8


def _round_up(n, m):
    return ((n + m - 1) // m) * m


def policy_kernel(x_ref, w1_ref, b1_ref, w2_ref, b2_ref, w3_ref, b3_ref, o_ref):
    # fc1 + relu  (bf16 operands on the MXU, f32 accumulate)
    x = x_ref[...].astype(jnp.bfloat16)
    h1 = jnp.dot(x, w1_ref[...], preferred_element_type=jnp.float32)
    h1 = jnp.maximum(h1 + b1_ref[...], 0.0)
    # fc2 + relu
    h2 = jnp.dot(h1.astype(jnp.bfloat16), w2_ref[...],
                 preferred_element_type=jnp.float32)
    h2 = jnp.maximum(h2 + b2_ref[...], 0.0)
    # fc3
    logits = jnp.dot(h2.astype(jnp.bfloat16), w3_ref[...],
                     preferred_element_type=jnp.float32)
    logits = logits + b3_ref[...]  # padded action cols carry -1e30 bias -> exp()=0
    # softmax over the lane-dense (padded to 128) action axis, numerically stable
    m = jnp.max(logits, axis=1, keepdims=True)
    e = jnp.exp(logits - m)
    denom = jnp.sum(e, axis=1, keepdims=True)
    o_ref[...] = (e * pl.reciprocal(denom, approx=True)).astype(o_ref.dtype)


def policy_forward(x, w1, b1, w2, b2, w3, b3, *, tile_b=256):
    B, S = x.shape
    H = w1.shape[1]
    H2 = w2.shape[1]
    A = w3.shape[1]

    # Lane-align every feature dim to 128.
    Sp, Hp, H2p, Ap = (_round_up(d, _LANE) for d in (S, H, H2, A))

    def pad2(a, rows, cols, fill=0.0):
        return jnp.pad(a, ((0, rows - a.shape[0]), (0, cols - a.shape[1])),
                       constant_values=fill)

    # Zero-padded weight rows/cols keep the dots exact; padded logits are
    # masked via the -1e30 bias so the softmax ignores them.
    w1p = pad2(w1, Sp, Hp).astype(jnp.bfloat16)
    w2p = pad2(w2, Hp, H2p).astype(jnp.bfloat16)
    w3p = pad2(w3, H2p, Ap).astype(jnp.bfloat16)
    b1p = pad2(b1, 1, Hp).astype(jnp.float32)
    b2p = pad2(b2, 1, H2p).astype(jnp.float32)
    b3p = pad2(b3, 1, Ap, fill=_NEG_LARGE).astype(jnp.float32)

    # Batch tiling: multiple of 8 sublanes; grid gives pipelining and (on v7x)
    # megacore sharding of the batch axis.
    tb = min(tile_b, _round_up(B, _SUBLANE))
    Bp = _round_up(B, tb)
    xp = pad2(x, Bp, Sp).astype(jnp.float32)
    grid = (Bp // tb,)

    full = lambda shape: pl.BlockSpec(shape, lambda i: (0, 0))

    cost = pl.CostEstimate(
        flops=2 * Bp * (Sp * Hp + Hp * H2p + H2p * Ap),
        transcendentals=Bp * Ap + Bp,
        bytes_accessed=(xp.size * 4
                        + (w1p.size + w2p.size + w3p.size) * 2
                        + (b1p.size + b2p.size + b3p.size) * 4
                        + Bp * Ap * 4),
    )

    out = pl.pallas_call(
        policy_kernel,
        out_shape=jax.ShapeDtypeStruct((Bp, Ap), jnp.float32),
        grid=grid,
        in_specs=[
            pl.BlockSpec((tb, Sp), lambda i: (i, 0)),   # x: tiled over batch
            full(w1p.shape),                            # weights/biases resident
            full(b1p.shape),
            full(w2p.shape),
            full(b2p.shape),
            full(w3p.shape),
            full(b3p.shape),
        ],
        out_specs=pl.BlockSpec((tb, Ap), lambda i: (i, 0)),
        compiler_params=pltpu.CompilerParams(
            dimension_semantics=("parallel",)),
        cost_estimate=cost,
    )(xp, w1p, b1p, w2p, b2p, w3p, b3p)

    return out[:B, :A]


def init_params(key, s_size, h_size, a_size):
    # Deterministic synthetic init (uniform, PyTorch-Linear-like bound 1/sqrt(fan_in))
    ks = jax.random.split(key, 6)

    def lin(kw, kb, fan_in, fan_out):
        bound = 1.0 / jnp.sqrt(fan_in)
        w = jax.random.uniform(kw, (fan_in, fan_out), jnp.float32, -bound, bound)
        b = jax.random.uniform(kb, (1, fan_out), jnp.float32, -bound, bound)
        return w, b

    w1, b1 = lin(ks[0], ks[1], s_size, h_size)
    w2, b2 = lin(ks[2], ks[3], h_size, h_size * 2)
    w3, b3 = lin(ks[4], ks[5], h_size * 2, a_size)
    return w1, b1, w2, b2, w3, b3


def _ref_forward_bf16(x, w1, b1, w2, b2, w3, b3):
    # Mirrors the kernel's arithmetic (bf16 operands, f32 accumulation).
    bf = jnp.bfloat16
    h1 = jnp.maximum(
        jnp.dot(x.astype(bf), w1.astype(bf), preferred_element_type=jnp.float32) + b1, 0.0)
    h2 = jnp.maximum(
        jnp.dot(h1.astype(bf), w2.astype(bf), preferred_element_type=jnp.float32) + b2, 0.0)
    logits = jnp.dot(h2.astype(bf), w3.astype(bf),
                     preferred_element_type=jnp.float32) + b3
    return jax.nn.softmax(logits, axis=1)


if __name__ == "__main__":
    key = jax.random.PRNGKey(0)
    k_x, k_p = jax.random.split(key)

    batch, s_size, h_size, a_size = 2, 8, 32, 4
    x = jax.random.normal(k_x, (batch, s_size), jnp.float32)
    params = init_params(k_p, s_size, h_size, a_size)

    probs = policy_forward(x, *params)
    probs = jax.block_until_ready(probs)

    # sanity vs. a reference using the same bf16/f32 mixed precision
    ref_bf16 = _ref_forward_bf16(x, *params)
    # and vs. a pure f32 reference (looser tol: bf16 weight rounding)
    w1, b1, w2, b2, w3, b3 = params
    h1 = jnp.maximum(x @ w1 + b1, 0.0)
    h2 = jnp.maximum(h1 @ w2 + b2, 0.0)
    ref_f32 = jax.nn.softmax(h2 @ w3 + b3, axis=1)

    assert probs.shape == (batch, a_size)
    assert jnp.allclose(probs, ref_bf16, atol=2e-3, rtol=2e-3)
    assert jnp.allclose(probs, ref_f32, atol=2e-2, rtol=2e-2)
    assert jnp.allclose(jnp.sum(probs, axis=1), 1.0, atol=5e-3)

    print("KERNEL_OK")
</pallas_src>

<mosaic_0001>
module attributes {stable_mosaic.version = 11 : i64} {
  func.func @policy_kernel(%arg0: i32, %arg1: memref<8x128xf32, #tpu.memory_space<vmem>>, %arg2: memref<128x128xbf16, #tpu.memory_space<vmem>>, %arg3: memref<1x128xf32, #tpu.memory_space<vmem>>, %arg4: memref<128x128xbf16, #tpu.memory_space<vmem>>, %arg5: memref<1x128xf32, #tpu.memory_space<vmem>>, %arg6: memref<128x128xbf16, #tpu.memory_space<vmem>>, %arg7: memref<1x128xf32, #tpu.memory_space<vmem>>, %arg8: memref<8x128xf32, #tpu.memory_space<vmem>>) attributes {dimension_semantics = [#tpu.dimension_semantics<parallel>], iteration_bounds = array<i64: 1>, scalar_prefetch = 0 : i64, scratch_operands = 0 : i64, tpu.core_type = #tpu.core_type<tc>, window_params = [{transform_indices = @transform_0, window_bounds = array<i64: 8, 128>}, {pipeline_mode = #tpu.pipeline_mode<synchronous>, transform_indices = @transform_1, window_bounds = array<i64: 128, 128>}, {pipeline_mode = #tpu.pipeline_mode<synchronous>, transform_indices = @transform_2, window_bounds = array<i64: 1, 128>}, {pipeline_mode = #tpu.pipeline_mode<synchronous>, transform_indices = @transform_3, window_bounds = array<i64: 128, 128>}, {pipeline_mode = #tpu.pipeline_mode<synchronous>, transform_indices = @transform_4, window_bounds = array<i64: 1, 128>}, {pipeline_mode = #tpu.pipeline_mode<synchronous>, transform_indices = @transform_5, window_bounds = array<i64: 128, 128>}, {pipeline_mode = #tpu.pipeline_mode<synchronous>, transform_indices = @transform_6, window_bounds = array<i64: 1, 128>}, {transform_indices = @transform_7, window_bounds = array<i64: 8, 128>}]} {
    %c0 = arith.constant 0 : index
    %c0_0 = arith.constant 0 : index
    %0 = vector.load %arg1[%c0, %c0_0] : memref<8x128xf32, #tpu.memory_space<vmem>>, vector<8x128xf32>
    %1 = arith.truncf %0 : vector<8x128xf32> to vector<8x128xbf16>
    %c0_1 = arith.constant 0 : index
    %c0_2 = arith.constant 0 : index
    %2 = vector.load %arg2[%c0_1, %c0_2] : memref<128x128xbf16, #tpu.memory_space<vmem>>, vector<128x128xbf16>
    %cst = arith.constant dense<0.000000e+00> : vector<8x128xf32>
    %3 = tpu.matmul %1, %2, %cst {dimension_numbers = #tpu.dot_dimension_numbers<[1], [0], [0], [1], [0, 0, 1, 1], [], []>} : vector<8x128xbf16>, vector<128x128xbf16>, vector<8x128xf32> -> vector<8x128xf32>
    %c0_3 = arith.constant 0 : index
    %c0_4 = arith.constant 0 : index
    %4 = vector.load %arg3[%c0_3, %c0_4] : memref<1x128xf32, #tpu.memory_space<vmem>>, vector<1x128xf32>
    %5 = vector.broadcast %4 : vector<1x128xf32> to vector<8x128xf32>
    %6 = arith.addf %3, %5 : vector<8x128xf32>
    %cst_5 = arith.constant 0.000000e+00 : f32
    %7 = vector.broadcast %cst_5 : f32 to vector<8x128xf32>
    %8 = arith.maximumf %6, %7 : vector<8x128xf32>
    %9 = arith.truncf %8 : vector<8x128xf32> to vector<8x128xbf16>
    %c0_6 = arith.constant 0 : index
    %c0_7 = arith.constant 0 : index
    %10 = vector.load %arg4[%c0_6, %c0_7] : memref<128x128xbf16, #tpu.memory_space<vmem>>, vector<128x128xbf16>
    %cst_8 = arith.constant dense<0.000000e+00> : vector<8x128xf32>
    %11 = tpu.matmul %9, %10, %cst_8 {dimension_numbers = #tpu.dot_dimension_numbers<[1], [0], [0], [1], [0, 0, 1, 1], [], []>} : vector<8x128xbf16>, vector<128x128xbf16>, vector<8x128xf32> -> vector<8x128xf32>
    %c0_9 = arith.constant 0 : index
    %c0_10 = arith.constant 0 : index
    %12 = vector.load %arg5[%c0_9, %c0_10] : memref<1x128xf32, #tpu.memory_space<vmem>>, vector<1x128xf32>
    %13 = vector.broadcast %12 : vector<1x128xf32> to vector<8x128xf32>
    %14 = arith.addf %11, %13 : vector<8x128xf32>
    %cst_11 = arith.constant 0.000000e+00 : f32
    %15 = vector.broadcast %cst_11 : f32 to vector<8x128xf32>
    %16 = arith.maximumf %14, %15 : vector<8x128xf32>
    %17 = arith.truncf %16 : vector<8x128xf32> to vector<8x128xbf16>
    %c0_12 = arith.constant 0 : index
    %c0_13 = arith.constant 0 : index
    %18 = vector.load %arg6[%c0_12, %c0_13] : memref<128x128xbf16, #tpu.memory_space<vmem>>, vector<128x128xbf16>
    %cst_14 = arith.constant dense<0.000000e+00> : vector<8x128xf32>
    %19 = tpu.matmul %17, %18, %cst_14 {dimension_numbers = #tpu.dot_dimension_numbers<[1], [0], [0], [1], [0, 0, 1, 1], [], []>} : vector<8x128xbf16>, vector<128x128xbf16>, vector<8x128xf32> -> vector<8x128xf32>
    %c0_15 = arith.constant 0 : index
    %c0_16 = arith.constant 0 : index
    %20 = vector.load %arg7[%c0_15, %c0_16] : memref<1x128xf32, #tpu.memory_space<vmem>>, vector<1x128xf32>
    %21 = vector.broadcast %20 : vector<1x128xf32> to vector<8x128xf32>
    %22 = arith.addf %19, %21 : vector<8x128xf32>
    %cst_17 = arith.constant dense<0xFF800000> : vector<8xf32>
    %23 = vector.multi_reduction <maximumf>, %22, %cst_17 [1] : vector<8x128xf32> to vector<8xf32>
    %24 = vector.shape_cast %23 : vector<8xf32> to vector<8x1xf32>
    %25 = vector.broadcast %24 : vector<8x1xf32> to vector<8x128xf32>
    %26 = arith.subf %22, %25 : vector<8x128xf32>
    %27 = math.exp %26 : vector<8x128xf32>
    %cst_18 = arith.constant dense<0.000000e+00> : vector<8xf32>
    %28 = vector.multi_reduction <add>, %27, %cst_18 [1] : vector<8x128xf32> to vector<8xf32>
    %29 = vector.shape_cast %28 : vector<8xf32> to vector<8x1xf32>
    %30 = tpu.reciprocal %29 {approx = true} : vector<8x1xf32> -> vector<8x1xf32>
    %31 = vector.broadcast %30 : vector<8x1xf32> to vector<8x128xf32>
    %32 = arith.mulf %27, %31 : vector<8x128xf32>
    %c0_19 = arith.constant 0 : index
    %c0_20 = arith.constant 0 : index
    %33 = vector.load %arg8[%c0_19, %c0_20] : memref<8x128xf32, #tpu.memory_space<vmem>>, vector<8x128xf32>
    tpu.vector_store %arg8[%c0_19, %c0_20], %32 {strides = array<i32>} : memref<8x128xf32, #tpu.memory_space<vmem>>, vector<8x128xf32>,
    return
  }
  func.func @transform_0(%arg0: i32) -> (i32, i32) {
    %c0_i32 = arith.constant 0 : i32
    %c0_i32_0 = arith.constant 0 : i32
    return %arg0, %c0_i32 : i32, i32
  }
  func.func @transform_1(%arg0: i32) -> (i32, i32) {
    %c0_i32 = arith.constant 0 : i32
    %c0_i32_0 = arith.constant 0 : i32
    %c0_i32_1 = arith.constant 0 : i32
    return %c0_i32, %c0_i32_0 : i32, i32
  }
  func.func @transform_2(%arg0: i32) -> (i32, i32) {
    %c0_i32 = arith.constant 0 : i32
    %c0_i32_0 = arith.constant 0 : i32
    %c0_i32_1 = arith.constant 0 : i32
    return %c0_i32, %c0_i32_0 : i32, i32
  }
  func.func @transform_3(%arg0: i32) -> (i32, i32) {
    %c0_i32 = arith.constant 0 : i32
    %c0_i32_0 = arith.constant 0 : i32
    %c0_i32_1 = arith.constant 0 : i32
    return %c0_i32, %c0_i32_0 : i32, i32
  }
  func.func @transform_4(%arg0: i32) -> (i32, i32) {
    %c0_i32 = arith.constant 0 : i32
    %c0_i32_0 = arith.constant 0 : i32
    %c0_i32_1 = arith.constant 0 : i32
    return %c0_i32, %c0_i32_0 : i32, i32
  }
  func.func @transform_5(%arg0: i32) -> (i32, i32) {
    %c0_i32 = arith.constant 0 : i32
    %c0_i32_0 = arith.constant 0 : i32
    %c0_i32_1 = arith.constant 0 : i32
    return %c0_i32, %c0_i32_0 : i32, i32
  }
  func.func @transform_6(%arg0: i32) -> (i32, i32) {
    %c0_i32 = arith.constant 0 : i32
    %c0_i32_0 = arith.constant 0 : i32
    %c0_i32_1 = arith.constant 0 : i32
    return %c0_i32, %c0_i32_0 : i32, i32
  }
  func.func @transform_7(%arg0: i32) -> (i32, i32) {
    %c0_i32 = arith.constant 0 : i32
    %c0_i32_0 = arith.constant 0 : i32
    return %arg0, %c0_i32 : i32, i32
  }
}

</mosaic_0001>

<bundles_post_ra>
// kernel: tpu_custom_call.1
= control target key start
LH: loop header
LB: loop body
LE: loop exit
PB: predicated region body
PF: predicated region fallthrough
CT: control target
= control target key end

     0   :  { %12 = vsyncpa [#allocation3], 0  ;;  %s873_s0 = inlined_call_operand.hbm [shape: f32[8,128], index: 0, kind: input, shape index: {}]   ;;  %s874_s1 = inlined_call_operand.hbm [shape: bf16[128,128], index: 1, kind: input, shape index: {}]   ;;  %s875_s2 = inlined_call_operand.vmem [shape: f32[1,128], index: 2, kind: input, shape index: {}]   ;;  %s876_s3 = inlined_call_operand.hbm [shape: bf16[128,128], index: 3, kind: input, shape index: {}]   ;;  %s877_s4 = inlined_call_operand.vmem [shape: f32[1,128], index: 4, kind: input, shape index: {}]   ;;  %s878_s5 = inlined_call_operand.hbm [shape: bf16[128,128], index: 5, kind: input, shape index: {}]   ;;  %s879_s6 = inlined_call_operand.vmem [shape: f32[1,128], index: 6, kind: input, shape index: {}]   ;;  %s880_s7 = inlined_call_operand.hbm [shape: f32[8,128], index: 7, kind: output, shape index: {}]  }
   0x1   :  { %13 = vsyncpa [#allocation6], 0 }
   0x2   :  { %14 = vsyncpa [#allocation9], 0 }
   0x3   :  { %15 = vsyncpa [#allocation4], 0  ;;  %s716_s24 = smov [#allocation5]   ;;  %s598_s28 = scalar_lea.hbm %s874_s1, 1024 }
   0x4   :  { %s31_s25 = sshll.u32 %s716_s24, 4  ;;  %p599_p0 = scmp.ne.s32.totalorder %s874_s1, %s598_s28  ;;  %s32_s25 = int_to_ptr.vmem [resolvable:$true] %s31_s25 }
   0x5   :  { %p602_p1 = scmp.lt.u32.totalorder %s598_s28, %s874_s1 }
   0x7   :  { %p604_p2 = pnand %p602_p1, %p599_p0 }
   0x9   :  { %607 = shalt.err (!%p604_p2)
}
   0xa   :  { %s608_s10 = scalar_lea.vmem %s32_s25, 1024  ;;  %p613_p4 = scmp.lt.s32.totalorder %s32_s25, %s32_s25 }
   0xb   :  { %p609_p3 = scmp.ne.s32.totalorder %s32_s25, %s608_s10  ;;  %p614_p5 = scmp.lt.s32.totalorder %s608_s10, %s608_s10 }
   0xd   :  { %p615_p6 = por %p614_p5, %p613_p4 }
   0xf   :  { %p616_p7 = pnand %p615_p6, %p609_p3 }
  0x11   :  { %619 = shalt.err (!%p616_p7)
}
  0x12   :  { %s717_s11 = smov 64   ;;  %s718_s12 = smov 4  }
  0x13   :  { %37 = dma.hbm_to_vmem [thread:$0]  %s874_s1, 1024, %s32_s25, [#allocation6], %s717_s11, %s717_s11, %s718_s12  }
  0x14   :  { %s719_s15 = smov [#allocation2]   ;;  %s720_s17 = smov [#allocation7]  }
  0x15   :  { %s22_s16 = sshll.u32 %s719_s15, 4  ;;  %s45_s18 = sshll.u32 %s720_s17, 4  ;;  %s23_s16 = int_to_ptr.vmem [resolvable:$true] %s22_s16  ;;  %s46_s18 = int_to_ptr.vmem [resolvable:$true] %s45_s18 }
  0x16   :  { %s620_s21 = scalar_lea.hbm %s873_s0, 128 }
  0x17   :  { %p621_p8 = scmp.ne.s32.totalorder %s873_s0, %s620_s21  ;;  %p624_p9 = scmp.lt.u32.totalorder %s620_s21, %s873_s0 }
  0x19   :  { %p626_p10 = pnand %p624_p9, %p621_p8 }
  0x1b   :  { %629 = shalt.err (!%p626_p10)
}
  0x1c   :  { %s630_s1 = scalar_lea.vmem %s23_s16, 128  ;;  %p635_p12 = scmp.lt.s32.totalorder %s23_s16, %s23_s16 }
  0x1d   :  { %p631_p11 = scmp.ne.s32.totalorder %s23_s16, %s630_s1  ;;  %p636_p13 = scmp.lt.s32.totalorder %s630_s1, %s630_s1 }
  0x1f   :  { %p637_p0 = por %p636_p13, %p635_p12 }
  0x21   :  { %p638_p1 = pnand %p637_p0, %p631_p11 }
  0x23   :  { %641 = shalt.err (!%p638_p1)
}
  0x24   :  { %25 = dma.hbm_to_vmem [thread:$0]  %s873_s0, 128, %s23_s16, [#allocation3]  }
  0x25   :  { %s642_s30 = scalar_lea.hbm %s876_s3, 1024 }
  0x26   :  { %p643_p2 = scmp.ne.s32.totalorder %s876_s3, %s642_s30  ;;  %p646_p3 = scmp.lt.u32.totalorder %s642_s30, %s876_s3 }
  0x28   :  { %p648_p4 = pnand %p646_p3, %p643_p2 }
  0x2a   :  { %651 = shalt.err (!%p648_p4)
}
  0x2b   :  { %s652_s14 = scalar_lea.vmem %s46_s18, 1024  ;;  %p657_p6 = scmp.lt.s32.totalorder %s46_s18, %s46_s18 }
  0x2c   :  { %p653_p5 = scmp.ne.s32.totalorder %s46_s18, %s652_s14  ;;  %p658_p7 = scmp.lt.s32.totalorder %s652_s14, %s652_s14 }
  0x2e   :  { %p659_p8 = por %p658_p7, %p657_p6 }
  0x30   :  { %p660_p9 = pnand %p659_p8, %p653_p5 }
  0x32   :  { %663 = shalt.err (!%p660_p9)
}
  0x33   :  { %51 = dma.hbm_to_vmem [thread:$0]  %s876_s3, 1024, %s46_s18, [#allocation6], %s717_s11, %s717_s11, %s718_s12  }
  0x34   :  { %s721_s16 = smov [#allocation8]   ;;  %s664_s21 = scalar_lea.hbm %s878_s5, 1024 }
  0x35   :  { %s59_s17 = sshll.u32 %s721_s16, 4  ;;  %p665_p10 = scmp.ne.s32.totalorder %s878_s5, %s664_s21  ;;  %s60_s17 = int_to_ptr.vmem [resolvable:$true] %s59_s17 }
  0x36   :  { %p668_p11 = scmp.lt.u32.totalorder %s664_s21, %s878_s5 }
  0x38   :  { %p670_p12 = pnand %p668_p11, %p665_p10 }
  0x3a   :  { %673 = shalt.err (!%p670_p12)
}
  0x3b   :  { %s674_s1 = scalar_lea.vmem %s60_s17, 1024  ;;  %p679_p0 = scmp.lt.s32.totalorder %s60_s17, %s60_s17 }
  0x3c   :  { %p675_p13 = scmp.ne.s32.totalorder %s60_s17, %s674_s1  ;;  %p680_p1 = scmp.lt.s32.totalorder %s674_s1, %s674_s1 }
  0x3e   :  { %p681_p2 = por %p680_p1, %p679_p0 }
  0x40   :  { %p682_p3 = pnand %p681_p2, %p675_p13 }
  0x42   :  { %685 = shalt.err (!%p682_p3)
}
  0x43   :  { %65 = dma.hbm_to_vmem [thread:$0]  %s878_s5, 1024, %s60_s17, [#allocation9], %s717_s11, %s717_s11, %s718_s12  }
  0x44   :  { %708 = dma.done.wait [#allocation3], 128  }
  0x45   :  { %709 = vsyncadd [#allocation3], 4294967168 }
  0x46   :  { %710 = dma.done.wait [#allocation6], 2048  }
  0x47   :  { %711 = vsyncadd [#allocation6], 4294965248 }
  0x48   :  { %712 = dma.done.wait [#allocation9], 1024  }
  0x49   :  { %713 = vsyncadd [#allocation9], 4294966272  ;;  %v722_v0 = vmov 0.0   ;;  %vm723_vm0 = vmmov 0   ;;  %v570_v1 = vld [vmem:[#allocation5] sm:$0xff]   ;;  %v571_v2 = vld [vmem:[#allocation5 + $0x8] sm:$0xff]  }
  0x4a   :  { %501 = vmatprep.subr.bf16.mxu0 %v722_v0  ;;  %517 = vmatprep.mubr.msk.bf16.mxu0 %vm723_vm0, %v722_v0  ;;  %v572_v3 = vld [vmem:[#allocation5 + $0x10] sm:$0xff]   ;;  %v578_v4 = vld [vmem:[#allocation7] sm:$0xff]   ;;  %v573_v5 = vld [vmem:[#allocation5 + $0x18] sm:$0xff]  }
  0x4b   :  { %521 = vmatprep.subr.bf16.mxu1 %v722_v0  ;;  %537 = vmatprep.mubr.msk.bf16.mxu1 %vm723_vm0, %v722_v0  ;;  %v579_v6 = vld [vmem:[#allocation7 + $0x8] sm:$0xff]   ;;  %v574_v7 = vld [vmem:[#allocation5 + $0x20] sm:$0xff]   ;;  %v580_v8 = vld [vmem:[#allocation7 + $0x10] sm:$0xff]  }
  0x4c   :  { %502 = vmatpush3.bf16.msra.mxu0 %v570_v1  ;;  %522 = vmatpush3.bf16.msra.mxu1 %v578_v4  ;;  %v575_v9 = vld [vmem:[#allocation5 + $0x28] sm:$0xff]   ;;  %v581_v10 = vld [vmem:[#allocation7 + $0x18] sm:$0xff]   ;;  %v576_v11 = vld [vmem:[#allocation5 + $0x30] sm:$0xff]  }
  0x4d   :  { %503 = vmatprep.subr.bf16.mxu0 %v722_v0  ;;  %523 = vmatprep.subr.bf16.mxu1 %v722_v0  ;;  %v582_v12 = vld [vmem:[#allocation7 + $0x20] sm:$0xff]   ;;  %v577_v13 = vld [vmem:[#allocation5 + $0x38] sm:$0xff]   ;;  %v583_v15 = vld [vmem:[#allocation7 + $0x28] sm:$0xff]  }
  0x4e   :  { %v81_v14 = vld [vmem:[#allocation2] sm:$0xff]  ;;  %v584_v17 = vld [vmem:[#allocation7 + $0x30] sm:$0xff]   ;;  %v586_v19 = vld [vmem:[#allocation8] sm:$0xff]  }
  0x4f   :  { %v82_v16 = vpack.c.bf16 %v81_v14, %v81_v14  ;;  %v585_v18 = vld [vmem:[#allocation7 + $0x38] sm:$0xff]   ;;  %v587_v20 = vld [vmem:[#allocation8 + $0x8] sm:$0xff]   ;;  %v588_v21 = vld [vmem:[#allocation8 + $0x10] sm:$0xff]  }
  0x50   :  { %504 = vmatpush3.bf16.msra.mxu0 %v571_v2  ;;  %524 = vmatpush3.bf16.msra.mxu1 %v579_v6  ;;  %v589_v22 = vld [vmem:[#allocation8 + $0x18] sm:$0xff]   ;;  %v590_v23 = vld [vmem:[#allocation8 + $0x20] sm:$0xff]   ;;  %v591_v24 = vld [vmem:[#allocation8 + $0x28] sm:$0xff]  }
  0x51   :  { %505 = vmatprep.subr.bf16.mxu0 %v722_v0  ;;  %525 = vmatprep.subr.bf16.mxu1 %v722_v0  ;;  %v447_v25 = vld [vmem:[%s875_s2] ss:$0 sm:$0xff]  ;;  %v592_v33 = vld [vmem:[#allocation8 + $0x30] sm:$0xff]  }
  0x52   :  { %v593_v34 = vld [vmem:[#allocation8 + $0x38] sm:$0xff]  }
  0x53   :  { %v456_v35 = vld [vmem:[%s877_s4] ss:$0 sm:$0xff]  ;;  %s724_s4 = smov [#allocation10]  }
  0x54   :  { %506 = vmatpush3.bf16.msra.mxu0 %v572_v3  ;;  %526 = vmatpush3.bf16.msra.mxu1 %v580_v8  ;;  %v465_v43 = vld [vmem:[%s879_s6] ss:$0 sm:$0xff]  ;;  %s436_s28 = sshll.u32 %s724_s4, 4  ;;  %s437_s28 = int_to_ptr.vmem [resolvable:$true] %s436_s28 }
  0x55   :  { %507 = vmatprep.subr.bf16.mxu0 %v722_v0  ;;  %527 = vmatprep.subr.bf16.mxu1 %v722_v0  ;;  %s686_s6 = scalar_lea.vmem %s437_s28, 128  ;;  %p691_p5 = scmp.lt.s32.totalorder %s437_s28, %s437_s28 }
  0x56   :  { %p687_p4 = scmp.ne.s32.totalorder %s437_s28, %s686_s6  ;;  %p692_p6 = scmp.lt.s32.totalorder %s686_s6, %s686_s6 }
  0x58   :  { %508 = vmatpush3.bf16.msra.mxu0 %v573_v5  ;;  %528 = vmatpush3.bf16.msra.mxu1 %v581_v10  ;;  %p693_p7 = por %p692_p6, %p691_p5 }
  0x59   :  { %509 = vmatprep.subr.bf16.mxu0 %v722_v0  ;;  %529 = vmatprep.subr.bf16.mxu1 %v722_v0 }
  0x5a   :  { %p694_p8 = pnand %p693_p7, %p687_p4 }
  0x5c   :  { %510 = vmatpush3.bf16.msra.mxu0 %v574_v7  ;;  %530 = vmatpush3.bf16.msra.mxu1 %v582_v12 }
  0x5d   :  { %511 = vmatprep.subr.bf16.mxu0 %v722_v0  ;;  %531 = vmatprep.subr.bf16.mxu1 %v722_v0 }
  0x60   :  { %512 = vmatpush3.bf16.msra.mxu0 %v575_v9  ;;  %532 = vmatpush3.bf16.msra.mxu1 %v583_v15 }
  0x61   :  { %513 = vmatprep.subr.bf16.mxu0 %v722_v0  ;;  %533 = vmatprep.subr.bf16.mxu1 %v722_v0 }
  0x64   :  { %514 = vmatpush3.bf16.msra.mxu0 %v576_v11  ;;  %534 = vmatpush3.bf16.msra.mxu1 %v584_v17 }
  0x65   :  { %515 = vmatprep.subr.bf16.mxu0 %v722_v0  ;;  %535 = vmatprep.subr.bf16.mxu1 %v722_v0 }
  0x68   :  { %516 = vmatpush3.bf16.msra.mxu0 %v577_v13  ;;  %536 = vmatpush3.bf16.msra.mxu1 %v585_v18 }
  0x69   :  { %541 = vmatprep.subr.bf16.mxu0 %v722_v0 }
  0x6b   :  { %518 = vmatmul.mubr.bf16.vlgmr.msra.gmra.mrb[0].mxu0 %v82_v16 }
  0x6c   :  { %557 = vmatprep.mubr.msk.bf16.mxu0 %vm723_vm0, %v722_v0  ;;  %542 = vmatpush3.bf16.msra.mxu0 %v586_v19 }
  0x6d   :  { %543 = vmatprep.subr.bf16.mxu0 %v722_v0 }
  0x70   :  { %544 = vmatpush3.bf16.msra.mxu0 %v587_v20 }
  0x71   :  { %545 = vmatprep.subr.bf16.mxu0 %v722_v0 }
  0x74   :  { %546 = vmatpush3.bf16.msra.mxu0 %v588_v21 }
  0x75   :  { %547 = vmatprep.subr.bf16.mxu0 %v722_v0 }
  0x78   :  { %548 = vmatpush3.bf16.msra.mxu0 %v589_v22 }
  0x79   :  { %549 = vmatprep.subr.bf16.mxu0 %v722_v0 }
  0x7c   :  { %550 = vmatpush3.bf16.msra.mxu0 %v590_v23 }
  0x7d   :  { %551 = vmatprep.subr.bf16.mxu0 %v722_v0 }
  0x80   :  { %552 = vmatpush3.bf16.msra.mxu0 %v591_v24 }
  0x81   :  { %553 = vmatprep.subr.bf16.mxu0 %v722_v0 }
  0x84   :  { %554 = vmatpush3.bf16.msra.mxu0 %v592_v33 }
  0x85   :  { %555 = vmatprep.subr.bf16.mxu0 %v722_v0 }
  0x88   :  { %556 = vmatpush3.bf16.msra.mxu0 %v593_v34 }
 0x13e   :  { %v188_v26 = vpop.f32.mrb[0].mxu0 }
 0x13f   :  { %v189_v27 = vadd.f32 %v447_v25, %v188_v26  ;;  %v519_v28 = vpop.f32.mrb[1].mxu0 }
 0x140   :  { %v191_v29 = vpop.f32.mrb[2].mxu0 }
 0x141   :  { %v194_v30 = vmax.f32 %v189_v27, 0.0  ;;  %v520_v31 = vpop.f32.mrb[3].mxu0 }
 0x143   :  { %v195_v32 = vpack.c.bf16 %v194_v30, %v194_v30 }
 0x145   :  { %538 = vmatmul.mubr.bf16.vlgmr.msra.gmra.mrb[0].mxu1 %v195_v32 }
 0x218   :  { %v301_v36 = vpop.f32.mrb[0].mxu1 }
 0x219   :  { %v302_v37 = vadd.f32 %v456_v35, %v301_v36  ;;  %v539_v38 = vpop.f32.mrb[1].mxu1 }
 0x21a   :  { %v304_v39 = vpop.f32.mrb[2].mxu1 }
 0x21b   :  { %v307_v40 = vmax.f32 %v302_v37, 0.0  ;;  %v540_v41 = vpop.f32.mrb[3].mxu1 }
 0x21d   :  { %v308_v42 = vpack.c.bf16 %v307_v40, %v307_v40 }
 0x21f   :  { %558 = vmatmul.mubr.bf16.vlgmr.msra.gmra.mrb[4].mxu0 %v308_v42 }
 0x2f2   :  { %v414_v44 = vpop.f32.mrb[4].mxu0 }
 0x2f3   :  { %v415_v45 = vadd.f32 %v465_v43, %v414_v44  ;;  %v559_v46 = vpop.f32.mrb[5].mxu0 }
 0x2f4   :  { %v417_v47 = vpop.f32.mrb[6].mxu0 }
 0x2f5   :  { %420 = vmax.xlane.f32.xlu0 %v415_v45  ;;  %v560_v48 = vpop.f32.mrb[7].mxu0 }
 0x382   :  { %v421_v49 = vpop.xlane.xlu0 %420 }
 0x383   :  { %v422_v50 = vsub.f32 %v415_v45, %v421_v49 }
 0x385   :  { %v423_v51 = vmul.f32 1.442695, %v422_v50 }
 0x387   :  { %594 = vpow2.f32 %v423_v51 }
 0x391   :  { %v595_v52 = vpop.eup %594 }
 0x392   :  { %425 = vadd.xlane.f32.xlu0 %v595_v52 }
 0x41f   :  { %v426_v53 = vpop.xlane.xlu0 %425 }
 0x420   :  { %596 = vrcp.f32 %v426_v53 }
 0x42a   :  { %v597_v54 = vpop.eup %596 }
 0x42b   :  { %v428_v55 = vmul.f32 %v597_v54, %v595_v52 }
 0x42d   :  { %429 = vst [vmem:[#allocation10] sm:$0xff] %v428_v55 }
 0x42e   :  { %697 = shalt.err (!%p694_p8)
}
 0x42f   :  { %s698_s8 = scalar_lea.hbm %s880_s7, 128 }
 0x430   :  { %p699_p9 = scmp.ne.s32.totalorder %s880_s7, %s698_s8  ;;  %p702_p10 = scmp.lt.u32.totalorder %s698_s8, %s880_s7 }
 0x432   :  { %p704_p11 = pnand %p702_p10, %p699_p9 }
 0x434   :  { %707 = shalt.err (!%p704_p11)
}
 0x435   :  { %439 = dma.vmem_to_hbm [thread:$0]  %s437_s28, 128, %s880_s7, [#allocation4]  }
 0x436   :  { %714 = dma.done.wait [#allocation4], 128  }
 0x437   :  { %715 = vsyncadd [#allocation4], 4294967168 }
 0x438   :  { %443 = vsyncpa [#allocation3], 1 }
 0x439   :  { %444 = vsyncpa [#allocation6], 1 }
 0x43a   :  { %445 = vsyncpa [#allocation9], 1 }
 0x43b   :  { %446 = vsyncpa [#allocation4], 1 }

</bundles_post_ra>
